<compile_context>
chip_gen: v7x
topology: tpu7x:2x2x1
jax: 0.10.0
libtpu: 0.0.40
codegen_flags: <defaults>
</compile_context>

<pallas_src>
import jax
import jax.numpy as jnp
from jax import lax
from jax.experimental import pallas as pl
from jax.experimental.pallas import tpu as pltpu


def _round_up(x: int, m: int) -> int:
    return (x + m - 1) // m * m


def _fc_kernel(x_ref, w_ref, b_ref, o_ref):
    # x_ref: (tb, K)   w_ref: (tn, K)   b_ref: (1, tn)   o_ref: (tb, tn)
    # Contract x dim 1 with w dim 1 directly (no transpose anywhere).
    acc = lax.dot_general(
        x_ref[...], w_ref[...],
        dimension_numbers=(((1,), (1,)), ((), ())),
        preferred_element_type=jnp.float32,
    )
    o_ref[...] = (acc + b_ref[...]).astype(o_ref.dtype)


def fc_head(x, weight, bias, *, tb=None, tn=None):
    """y = x @ weight.T + bias  (nn.Linear forward), weight in PyTorch (N, K) layout."""
    B, K = x.shape
    N, K2 = weight.shape
    assert K == K2 and bias.shape == (N,)

    # --- pad N to a lane-dense multiple of 128 (feedback: avoid masked vst) ---
    n_pad = _round_up(N, 128)
    if n_pad != N:
        weight = jnp.pad(weight, ((0, n_pad - N), (0, 0)))
        bias = jnp.pad(bias, ((0, n_pad - N),))
    b2d = bias.reshape(1, n_pad)

    # --- tile sizes: big batch tile to fill the 128/256-wide MXU -------------
    if tb is None:
        tb = min(256, _round_up(B, 8))        # multiple of 8, capped by B
    if tn is None:
        tn = min(256, n_pad)                  # multiple of 128, capped by n_pad

    grid = (pl.cdiv(B, tb), pl.cdiv(n_pad, tn))

    itemsize = jnp.dtype(x.dtype).itemsize
    cost = pl.CostEstimate(
        flops=2 * B * K * n_pad,
        transcendentals=0,
        bytes_accessed=(B * K + n_pad * K + n_pad + B * n_pad) * itemsize,
    )

    # VMEM footprint per step (double-buffered): ~2*(tb*K + tn*K + tb*tn)*4 B,
    # e.g. ~9 MiB at tb=tn=256, K=2048 f32 -> fits every generation's default;
    # the explicit limit just leaves headroom if callers pick larger tiles.
    out = pl.pallas_call(
        _fc_kernel,
        out_shape=jax.ShapeDtypeStruct((B, n_pad), x.dtype),
        grid_spec=pltpu.PrefetchScalarGridSpec(
            num_scalar_prefetch=0,
            grid=grid,
            in_specs=[
                pl.BlockSpec((tb, K), lambda i, j: (i, 0)),   # x row-tile (reused over j)
                pl.BlockSpec((tn, K), lambda i, j: (j, 0)),   # weight N-tile, streamed
                pl.BlockSpec((1, tn), lambda i, j: (0, j)),   # bias N-tile
            ],
            out_specs=pl.BlockSpec((tb, tn), lambda i, j: (i, j)),
        ),
        compiler_params=pltpu.CompilerParams(
            dimension_semantics=("parallel", "parallel"),
            vmem_limit_bytes=48 * 1024 * 1024,
        ),
        cost_estimate=cost,
    )(x, weight, b2d)

    return out[:, :N] if n_pad != N else out


if __name__ == "__main__":
    # Small deterministic shapes consistent with a pooled-feature -> fc head
    # (real ResNeXt is 2048 -> 1000; scaled down but keeping N=1000 to exercise
    # the lane padding path).
    batch, in_features, num_classes = 16, 512, 1000

    key = jax.random.PRNGKey(0)
    kx, kw, kb = jax.random.split(key, 3)
    x = jax.random.normal(kx, (batch, in_features), dtype=jnp.float32)
    bound = 1.0 / (in_features ** 0.5)
    weight = jax.random.uniform(kw, (num_classes, in_features),
                                minval=-bound, maxval=bound, dtype=jnp.float32)
    bias = jax.random.uniform(kb, (num_classes,),
                              minval=-bound, maxval=bound, dtype=jnp.float32)

    y = fc_head(x, weight, bias)
    jax.block_until_ready(y)

    y_ref = x @ weight.T + bias
    assert y.shape == (batch, num_classes)
    assert jnp.allclose(y, y_ref, atol=1e-4, rtol=1e-4)
    print("KERNEL_OK")
</pallas_src>

<mosaic_0001>
module attributes {stable_mosaic.version = 11 : i64} {
  func.func @_fc_kernel(%arg0: i32, %arg1: i32, %arg2: memref<16x512xf32, #tpu.memory_space<vmem>>, %arg3: memref<256x512xf32, #tpu.memory_space<vmem>>, %arg4: memref<1x256xf32, #tpu.memory_space<vmem>>, %arg5: memref<16x256xf32, #tpu.memory_space<vmem>>) attributes {dimension_semantics = [#tpu.dimension_semantics<parallel>, #tpu.dimension_semantics<parallel>], iteration_bounds = array<i64: 1, 4>, scalar_prefetch = 0 : i64, scratch_operands = 0 : i64, tpu.core_type = #tpu.core_type<tc>, window_params = [{transform_indices = @transform_0, window_bounds = array<i64: 16, 512>}, {transform_indices = @transform_1, window_bounds = array<i64: 256, 512>}, {transform_indices = @transform_2, window_bounds = array<i64: 1, 256>}, {transform_indices = @transform_3, window_bounds = array<i64: 16, 256>}]} {
    %c0 = arith.constant 0 : index
    %c0_0 = arith.constant 0 : index
    %0 = vector.load %arg2[%c0, %c0_0] : memref<16x512xf32, #tpu.memory_space<vmem>>, vector<16x512xf32>
    %c0_1 = arith.constant 0 : index
    %c0_2 = arith.constant 0 : index
    %1 = vector.load %arg3[%c0_1, %c0_2] : memref<256x512xf32, #tpu.memory_space<vmem>>, vector<256x512xf32>
    %cst = arith.constant dense<0.000000e+00> : vector<16x256xf32>
    %2 = tpu.matmul %0, %1, %cst {dimension_numbers = #tpu.dot_dimension_numbers<[1], [1], [0], [0], [0, 0, 1, 0], [], []>} : vector<16x512xf32>, vector<256x512xf32>, vector<16x256xf32> -> vector<16x256xf32>
    %c0_3 = arith.constant 0 : index
    %c0_4 = arith.constant 0 : index
    %3 = vector.load %arg4[%c0_3, %c0_4] : memref<1x256xf32, #tpu.memory_space<vmem>>, vector<1x256xf32>
    %4 = vector.broadcast %3 : vector<1x256xf32> to vector<16x256xf32>
    %5 = arith.addf %2, %4 : vector<16x256xf32>
    %c0_5 = arith.constant 0 : index
    %c0_6 = arith.constant 0 : index
    %6 = vector.load %arg5[%c0_5, %c0_6] : memref<16x256xf32, #tpu.memory_space<vmem>>, vector<16x256xf32>
    tpu.vector_store %arg5[%c0_5, %c0_6], %5 {strides = array<i32>} : memref<16x256xf32, #tpu.memory_space<vmem>>, vector<16x256xf32>,
    return
  }
  func.func @transform_0(%arg0: i32, %arg1: i32) -> (i32, i32) {
    %c0_i32 = arith.constant 0 : i32
    %c0_i32_0 = arith.constant 0 : i32
    return %arg0, %c0_i32 : i32, i32
  }
  func.func @transform_1(%arg0: i32, %arg1: i32) -> (i32, i32) {
    %c0_i32 = arith.constant 0 : i32
    %c0_i32_0 = arith.constant 0 : i32
    return %arg1, %c0_i32 : i32, i32
  }
  func.func @transform_2(%arg0: i32, %arg1: i32) -> (i32, i32) {
    %c0_i32 = arith.constant 0 : i32
    %c0_i32_0 = arith.constant 0 : i32
    return %c0_i32, %arg1 : i32, i32
  }
  func.func @transform_3(%arg0: i32, %arg1: i32) -> (i32, i32) {
    %c0_i32 = arith.constant 0 : i32
    return %arg0, %arg1 : i32, i32
  }
}

</mosaic_0001>

<bundles_post_ra>
// kernel: tpu_custom_call.1
= control target key start
LH: loop header
LB: loop body
LE: loop exit
PB: predicated region body
PF: predicated region fallthrough
CT: control target
= control target key end

     0   :  { %s1551_s0 = inlined_call_operand.hbm [shape: f32[16,512], index: 0, kind: input, shape index: {}]   ;;  %s1552_s1 = inlined_call_operand.hbm [shape: f32[1024,512], index: 1, kind: input, shape index: {}]   ;;  %s1553_s2 = inlined_call_operand.hbm [shape: f32[1,1024], index: 2, kind: input, shape index: {}]   ;;  %s1554_s3 = inlined_call_operand.hbm [shape: f32[16,1024], index: 3, kind: output, shape index: {}]  }
   0x1   :  { %1565 = sst [smem:[#allocation13_spill]] %s1552_s1 }
   0x2   :  { %8 = vsyncpa [#allocation3], 0 }
   0x3   :  { %9 = vsyncpa [#allocation6], 0 }
   0x4   :  { %11 = vsyncpa [#allocation6 + $0x1], 0 }
   0x5   :  { %12 = vsyncpa [#allocation4], 0 }
   0x6   :  { %14 = vsyncpa [#allocation4 + $0x1], 0  ;;  %s1159_s12 = smov 0   ;;  %s1161_s13 = smov 0  }
   0x7   :  { %s1163_s14 = smov 0   ;;  %s1165_s15 = smov 0  }
   0x8   :  { %s1167_s16 = smov 0   ;;  %s1169_s17 = smov 0  }
   0x9 LB: > { %s29_s18 = sadd.s32 1, %s1124_s16  ;;  %s65_s19 = sadd.s32 1, %s1116_s14  ;;  %s1128_s17 = sphi %s1169_s17, %s20_s17   ;;  %s1124_s16 = sphi %s1167_s16, %s1591_s16   ;;  %s1120_s15 = sphi %s1165_s15, %s1590_s15   ;;  %s1116_s14 = sphi %s1163_s14, %s1589_s14   ;;  %s1112_s13 = sphi %s1161_s13, %s1588_s13   ;;  %s1108_s12 = sphi %s1159_s12, %s1587_s12  }
   0xa   : > { %p30_p0 = scmp.ge.s32.totalorder %s29_s18, 4  ;;  %p72_p1 = scmp.ne.s32.totalorder %s1116_s14, %s1112_s13 }
   0xb   : > { %p73_p2 = scmp.eq.s32.totalorder %s1128_s17, 0  ;;  %p897_p5 = scmp.lt.s32.totalorder %s1128_s17, 4 }
   0xc   : > { %s1593_s18 = smov (%p30_p0, %s29_s18), 0  ;;  %s173_s22 = sand.u32 1, %s1128_s17  }
   0xd   : > { %1566 = sst [smem:[#allocation12_spill]] %s1593_s18  ;;  %p1199_p3 = por %p73_p2, %p72_p1 }
   0xe   : > { %s62_s21 = ssub.s32 %s1124_s16, %s1593_s18  ;;  %s175_s23 = sand.u32 1, %s1116_s14  }
   0xf   : > { %p63_p4 = scmp.eq.s32.totalorder %s62_s21, 0  ;;  %s714_s25 = sshll.u32 %s175_s23, 10 }
  0x10   : > { %s732_s26 = sshll.u32 %s1124_s16, 14  ;;  %s1568_s1 = sld [smem:[#allocation13_spill]] }
  0x11   : > { %s1209_s24 = scalar_select %p63_p4, %s1116_s14, %s65_s19  }
  0x12   : > { %s177_s30 = scalar_lea.vmem [#allocation5], %s714_s25  ;;  %p1223_p6 = pnand %p897_p5, %p1199_p3 }
  0x13   : > { %s185_s4 = sshll.u32 %s177_s30, 4  ;;  %s1227_s6 = scalar_lea.sflag [#allocation6], %s173_s22  ;;  %s1219_s4 = int_to_ptr.vmem [resolvable:$true] %s185_s4 }
  0x14   : > { %s1569_s5 = scalar_select %p1223_p6, 1, 0 }
  0x15   : > { %p1559_p8 = pneg %p1223_p6 }
  0x16   : > { %s1217_s29 = scalar_lea.hbm %s1568_s1, %s732_s26  ;;  %s959_s10 = scalar_lea.hbm %s1568_s1, 65536 }
  0x17   : > { %s954_s7 = scalar_lea.hbm %s1217_s29, 16384  ;;  %p960_p11 = scmp.lt.u32.totalorder %s1217_s29, %s1568_s1 }
  0x18   : > { %p955_p7 = scmp.ne.s32.totalorder %s1217_s29, %s954_s7  ;;  %p961_p12 = scmp.lt.u32.totalorder %s959_s10, %s954_s7 }
  0x19   : > { %p963_p0 = scmp.lt.u32.totalorder %s954_s7, %s1217_s29 }
  0x1a   : > { %p957_p9 = pnand %p1559_p8, %p955_p7  ;;  %p962_p13 = por %p961_p12, %p960_p11 }
  0x1c   : > { %p958_p10 = pneg %p957_p9  ;;  %p964_p2 = por %p963_p0, %p962_p13 }
  0x1e   : > { %p965_p3 = pnand %p964_p2, %p958_p10 }
  0x20   : > { %968 = shalt.err (!%p965_p3)
}
  0x21   : > { %s969_s20 = scalar_lea.vmem %s1219_s4, 16384  ;;  %s1130_s21 = smov [#allocation5]  }
  0x22   : > { %p970_p4 = scmp.ne.s32.totalorder %s1219_s4, %s969_s20  ;;  %s974_s22 = sshll.u32 %s1130_s21, 4  ;;  %s975_s22 = int_to_ptr.vmem [resolvable:$false] %s974_s22 }
  0x23   : > { %s976_s25 = scalar_lea.vmem %s975_s22, 32768  ;;  %p977_p9 = scmp.lt.s32.totalorder %s1219_s4, %s975_s22 }
  0x24   : > { %p972_p5 = pnand %p970_p4, %p1559_p8  ;;  %p978_p11 = scmp.lt.s32.totalorder %s976_s25, %s969_s20 }
  0x26   : > { %p973_p7 = pneg %p972_p5  ;;  %p979_p12 = por %p978_p11, %p977_p9 }
  0x28   : > { %p980_p13 = pnand %p979_p12, %p973_p7 }
  0x2a   : > { %983 = shalt.err (!%p980_p13)
}
  0x2b   : > { %s1555_s26 = smov 512   ;;  %s1556_s27 = smov 32  }
  0x2c   : > { %888 = dma.hbm_to_vmem [thread:$0]  (!%p1223_p6), %s1217_s29, 16384, %s1219_s4, %s1227_s6, %s1555_s26, %s1555_s26, %s1556_s27  }
  0x2d   : > { %s1259_s28 = sadd.s32 4294967295, %s1128_s17   ;;  %s710_s30 = sadd.s32 4294967294, %s1128_s17  }
  0x2e   : > { %p78_p10 = scmp.ne.s32.totalorder %s1112_s13, %s1108_s12  ;;  %p1558_p0 = scmp.eq.s32.totalorder %s1259_s28, 0 }
  0x2f   : > { %p130_p2 = scmp.eq.s32.totalorder %s1259_s28, 3  ;;  %p136_p3 = scmp.eq.s32.totalorder %s710_s30, 3 }
  0x30   : > { %p711_p4 = scmp.ge.s32.totalorder %s1128_s17, 1  ;;  %p1269_p5 = por %p1558_p0, %p78_p10 }
  0x31   : > { %p1276_p7 = por %p130_p2, %p72_p1  ;;  %p1280_p9 = por %p136_p3, %p78_p10 }
  0x32   : > { %s1570_s7 = scalar_select %p1269_p5, 1, 0 }
  0x33   : > { %s1571_s29 = scalar_select %p1276_p7, 1, 0 }
  0x34   : > { %s1572_s4 = scalar_select %p1280_p9, 1, 0 }
  0x35   : > { %p143_p11 = scmp.lt.s32.totalorder %s1128_s17, 5  ;;  %s1133_s9 = smov [#allocation2]  }
  0x36   : > { %s159_s10 = sshll.u32 %s1133_s9, 4  ;;  %s718_s11 = sshll.u32 %s175_s23, 1  ;;  %s160_s10 = int_to_ptr.vmem [resolvable:$true] %s159_s10 }
  0x37   : > { %p1285_p12 = pnand %p711_p4, %p143_p11  ;;  %s733_s19 = sshll.u32 %s1124_s16, 5 }
  0x38   : > { %s199_s20 = scalar_lea.vmem [#allocation7], %s718_s11  ;;  %s1303_s26 = scalar_lea.hbm %s1553_s2, %s733_s19 }
  0x39   : > { %s1573_s8 = scalar_select %p1285_p12, 1, 0 }
  0x3a   : > { %p881_p13 = pneg %p1285_p12  ;;  %s207_s21 = sshll.u32 %s199_s20, 4  ;;  %s1305_s21 = int_to_ptr.vmem [resolvable:$true] %s207_s21 }
  0x3b   : > { %s984_s27 = scalar_lea.hbm %s1551_s0, 1024 }
  0x3c   : > { %p1296_p1 = pnand %p881_p13, %p1558_p0  ;;  %p985_p10 = scmp.ne.s32.totalorder %s1551_s0, %s984_s27 }
  0x3d   : > { %p991_p11 = scmp.lt.u32.totalorder %s984_s27, %s1551_s0 }
  0x3e   : > { %p986_p2 = pneg %p1296_p1 }
  0x40   : > { %p987_p3 = pnand %p986_p2, %p985_p10 }
  0x42   : > { %p988_p4 = pneg %p987_p3 }
  0x44   : > { %p993_p13 = pnand %p991_p11, %p988_p4 }
  0x46   : > { %996 = shalt.err (!%p993_p13)
}
  0x47   : > { %s997_s19 = scalar_lea.vmem %s160_s10, 1024  ;;  %p1005_p7 = scmp.lt.s32.totalorder %s160_s10, %s160_s10 }
  0x48   : > { %p998_p0 = scmp.ne.s32.totalorder %s160_s10, %s997_s19  ;;  %p1006_p5 = scmp.lt.s32.totalorder %s997_s19, %s997_s19 }
  0x4a   : > { %p1000_p8 = pnand %p998_p0, %p986_p2  ;;  %p1007_p12 = por %p1006_p5, %p1005_p7 }
  0x4c   : > { %p1001_p9 = pneg %p1000_p8 }
  0x4e   : > { %p1008_p6 = pnand %p1007_p12, %p1001_p9 }
  0x50   : > { %1011 = shalt.err (!%p1008_p6)
}
  0x51   : > { %s1575_s25 = smov 32   ;;  %s1576_s30 = smov 512  }
  0x52   : > { %884 = dma.hbm_to_vmem [thread:$0]  (!%p1296_p1), %s1551_s0, 1024, %s160_s10, [#allocation3], %s1576_s30, %s1576_s30, %s1575_s25  }
  0x53   : > { %s1012_s1 = scalar_lea.hbm %s1303_s26, 32  ;;  %p1577_p0 = scmp.ne.s32.totalorder %s1569_s5, 0 }
  0x54   : > { %p1013_p8 = scmp.ne.s32.totalorder %s1303_s26, %s1012_s1  ;;  %s1017_s22 = scalar_lea.hbm %s1553_s2, 128 }
  0x55   : > { %p1578_p5 = pneg %p1577_p0  ;;  %p1018_p9 = scmp.lt.u32.totalorder %s1303_s26, %s1553_s2 }
  0x56   : > { %p1019_p12 = scmp.lt.u32.totalorder %s1017_s22, %s1012_s1  ;;  %p1021_p2 = scmp.lt.u32.totalorder %s1012_s1, %s1303_s26 }
  0x57   : > { %p1015_p7 = pnand %p1013_p8, %p1578_p5 }
  0x58   : > { %p1020_p10 = por %p1019_p12, %p1018_p9 }
  0x59   : > { %p1016_p6 = pneg %p1015_p7 }
  0x5a   : > { %p1022_p3 = por %p1021_p2, %p1020_p10 }
  0x5c   : > { %p1023_p4 = pnand %p1022_p3, %p1016_p6 }
  0x5e   : > { %1026 = shalt.err (!%p1023_p4)
}
  0x5f   : > { %s1027_s10 = scalar_lea.vmem %s1305_s21, 32  ;;  %p1579_p11 = pmov %p1578_p5 }
  0x60   : > { %p1028_p1 = scmp.ne.s32.totalorder %s1305_s21, %s1027_s10  ;;  %s1134_s19 = smov [#allocation7]  }
  0x61   : > { %s1032_s25 = sshll.u32 %s1134_s19, 4  ;;  %s1033_s25 = int_to_ptr.vmem [resolvable:$false] %s1032_s25 }
  0x62   : > { %p1030_p13 = pnand %p1028_p1, %p1579_p11  ;;  %s1034_s30 = scalar_lea.vmem %s1033_s25, 64 }
  0x63   : > { %p1035_p5 = scmp.lt.s32.totalorder %s1305_s21, %s1033_s25  ;;  %p1036_p7 = scmp.lt.s32.totalorder %s1034_s30, %s1027_s10 }
  0x64   : > { %p1031_p8 = pneg %p1030_p13 }
  0x65   : > { %p1037_p9 = por %p1036_p7, %p1035_p5 }
  0x67   : > { %p1038_p12 = pnand %p1037_p9, %p1031_p8 }
  0x69   : > { %1041 = shalt.err (!%p1038_p12)
}
  0x6a   : > { %891 = dma.hbm_to_vmem [thread:$0]  (!%p1577_p0), %s1303_s26, 32, %s1305_s21, %s1227_s6  }
  0x6b   : > { %p1580_p6 = scmp.ne.s32.totalorder %s1573_s8, 0 }
  0x6c   : > { %p1581_p10 = scmp.eq.s32.totalorder (!%p1580_p6), %s1259_s28, 0 }
  0x6d   : > { %216 = sbr.rel (%p1580_p6) target bundleno = 491 (0x1eb), region = 32 }
  0x74   : > { %1095 = dma.done.wait (%p1581_p10), [#allocation3], 1024   ;;  %p1582_p2 = pmov %p1581_p10 }
  0x75   : > { %s222_s23 = sand.u32 1, %s1259_s28   ;;  %s1358_s9 = sand.u32 1, %s1112_s13  }
  0x76   : > { %1097 = vsyncadd (%p1582_p2), [#allocation3], 4294966272  ;;  %s723_s5 = sshll.u32 %s1358_s9, 10  ;;  %s223_s1 = scalar_lea.sflag [#allocation6], %s222_s23 }
  0x77   : > { %s1361_s18 = scalar_lea.vmem [#allocation5], %s723_s5  ;;  %p1583_p0 = scmp.ne.s32.totalorder %s1570_s7, 0 }
  0x79   : > { %1099 = dma.done.wait (%p1583_p0), %s223_s1, 16416  }
  0x7a   : > { %1101 = vsyncadd (%p1583_p0), %s223_s1, 4294950880  ;;  %v277_v0 = vld [vmem:[%s1361_s18 + $0x8] sm:$0xff]  ;;  %v276_v2 = vld [vmem:[%s1361_s18] sm:$0xff]  ;;  %s724_s6 = sshll.u32 %s1358_s9, 1  ;;  %s725_s28 = sshll.u32 %s1358_s9, 5 }
  0x7b   : > { %v281_v1 = vld [vmem:[%s1361_s18 + $0x28] sm:$0xff]  ;;  %v280_v4 = vld [vmem:[%s1361_s18 + $0x20] sm:$0xff]  ;;  %v279_v5 = vld [vmem:[%s1361_s18 + $0x18] sm:$0xff]  ;;  %s235_s26 = scalar_lea.vmem [#allocation7], %s724_s6  ;;  %s262_s7 = scalar_lea.vmem [#allocation8], %s725_s28 }
  0x7c   : > { %v735_v3 = vpack.c.bf16 %v281_v1, %v277_v0  ;;  %v283_v6 = vld [vmem:[%s1361_s18 + $0x38] sm:$0xff]  ;;  %v737_v7 = vpack.c.bf16 %v280_v4, %v276_v2  ;;  %v278_v9 = vld [vmem:[%s1361_s18 + $0x10] sm:$0xff]  ;;  %v285_v11 = vld [vmem:[%s1361_s18 + $0x48] sm:$0xff]  ;;  %s591_s8 = sshll.u32 %s262_s7, 4  ;;  %s734_s21 = sshll.u32 %s1120_s15, 8  ;;  %s1498_s8 = int_to_ptr.vmem [resolvable:$true] %s591_s8 }
  0x7d   : > { %v799_v8 = vpack.c.bf16 %v283_v6, %v279_v5  ;;  %v282_v10 = vld [vmem:[%s1361_s18 + $0x30] sm:$0xff]  ;;  %v289_v13 = vld [vmem:[%s1361_s18 + $0x68] sm:$0xff]  ;;  %v287_v15 = vld [vmem:[%s1361_s18 + $0x58] sm:$0xff]  ;;  %s1503_s11 = scalar_lea.hbm %s1554_s3, %s734_s21  ;;  %s575_s15 = scalar_lea.sflag [#allocation4], %s1358_s9 }
  0x7e   : > { %736 = vmatprep.subr.bf16.mxu1 %v735_v3  ;;  %v801_v12 = vpack.c.bf16 %v282_v10, %v278_v9  ;;  %v739_v14 = vpack.c.bf16 %v289_v13, %v285_v11  ;;  %v291_v16 = vld [vmem:[%s1361_s18 + $0x78] sm:$0xff]  ;;  %v284_v17 = vld [vmem:[%s1361_s18 + $0x40] sm:$0xff]  ;;  %v286_v20 = vld [vmem:[%s1361_s18 + $0x50] sm:$0xff]  ;;  %s1042_s20 = scalar_lea.vmem %s1498_s8, 512  ;;  %p1584_p4 = scmp.ne.s32.totalorder %s1571_s29, 0 }
  0x7f   : > { %738 = vmatpush1.bf16.xpose.msra.mxu1 %v737_v7  ;;  %800 = vmatprep.subr.bf16.mxu0 %v799_v8  ;;  %v288_v18 = vld [vmem:[%s1361_s18 + $0x60] sm:$0xff]  ;;  %v803_v19 = vpack.c.bf16 %v291_v16, %v287_v15  ;;  %v290_v21 = vld [vmem:[%s1361_s18 + $0x70] sm:$0xff]  ;;  %v293_v22 = vld [vmem:[%s1361_s18 + $0x88] sm:$0xff]  ;;  %p1043_p3 = scmp.ne.s32.totalorder %s1498_s8, %s1042_s20  ;;  %s1135_s10 = smov [#allocation8]  }
  0x80   : > { %802 = vmatpush1.bf16.xpose.msra.mxu0 %v801_v12  ;;  %740 = vmatprep.subr.bf16.mxu1 %v739_v14  ;;  %v297_v23 = vld [vmem:[%s1361_s18 + $0xa8] sm:$0xff]  ;;  %v295_v24 = vld [vmem:[%s1361_s18 + $0x98] sm:$0xff]  ;;  %v741_v26 = vpack.c.bf16 %v288_v18, %v284_v17  ;;  %v805_v27 = vpack.c.bf16 %v290_v21, %v286_v20  ;;  %v292_v30 = vld [vmem:[%s1361_s18 + $0x80] sm:$0xff]  ;;  %s1046_s19 = sshll.u32 %s1135_s10, 4  ;;  %s1047_s19 = int_to_ptr.vmem [resolvable:$false] %s1046_s19 }
  0x81   : > { %804 = vmatprep.subr.bf16.mxu0 %v803_v19  ;;  %v299_v25 = vld [vmem:[%s1361_s18 + $0xb8] sm:$0xff]  ;;  %v743_v28 = vpack.c.bf16 %v297_v23, %v293_v22  ;;  %v296_v31 = vld [vmem:[%s1361_s18 + $0xa0] sm:$0xff]  ;;  %v294_v32 = vld [vmem:[%s1361_s18 + $0x90] sm:$0xff]  ;;  %p1044_p1 = pnand %p1043_p3, %p1584_p4  ;;  %s1048_s25 = scalar_lea.vmem %s1047_s19, 1024 }
  0x82   : > { %v807_v29 = vpack.c.bf16 %v299_v25, %v295_v24  ;;  %v298_v33 = vld [vmem:[%s1361_s18 + $0xb0] sm:$0xff]  ;;  %v301_v34 = vld [vmem:[%s1361_s18 + $0xc8] sm:$0xff]  ;;  %v303_v36 = vld [vmem:[%s1361_s18 + $0xd8] sm:$0xff]  ;;  %v745_v38 = vpack.c.bf16 %v296_v31, %v292_v30  ;;  %p1049_p13 = scmp.lt.s32.totalorder %s1498_s8, %s1047_s19  ;;  %p1050_p8 = scmp.lt.s32.totalorder %s1048_s25, %s1042_s20 }
  0x83   : > { %v305_v35 = vld [vmem:[%s1361_s18 + $0xe8] sm:$0xff]  ;;  %v307_v37 = vld [vmem:[%s1361_s18 + $0xf8] sm:$0xff]  ;;  %v809_v39 = vpack.c.bf16 %v298_v33, %v294_v32  ;;  %v300_v42 = vld [vmem:[%s1361_s18 + $0xc0] sm:$0xff]  ;;  %p1045_p11 = pneg %p1044_p1 }
  0x84   : > { %v747_v40 = vpack.c.bf16 %v305_v35, %v301_v34  ;;  %v811_v41 = vpack.c.bf16 %v307_v37, %v303_v36  ;;  %v304_v43 = vld [vmem:[%s1361_s18 + $0xe0] sm:$0xff]  ;;  %v302_v44 = vld [vmem:[%s1361_s18 + $0xd0] sm:$0xff]  ;;  %v309_v46 = vld [vmem:[%s1361_s18 + $0x108] sm:$0xff]  ;;  %p1051_p5 = por %p1050_p8, %p1049_p13 }
  0x85   : > { %v306_v45 = vld [vmem:[%s1361_s18 + $0xf0] sm:$0xff]  ;;  %v313_v47 = vld [vmem:[%s1361_s18 + $0x128] sm:$0xff]  ;;  %v311_v48 = vld [vmem:[%s1361_s18 + $0x118] sm:$0xff]  ;;  %v749_v50 = vpack.c.bf16 %v304_v43, %v300_v42 }
  0x86   : > { %v315_v49 = vld [vmem:[%s1361_s18 + $0x138] sm:$0xff]  ;;  %v813_v51 = vpack.c.bf16 %v306_v45, %v302_v44  ;;  %v751_v52 = vpack.c.bf16 %v313_v47, %v309_v46  ;;  %v308_v54 = vld [vmem:[%s1361_s18 + $0x100] sm:$0xff]  ;;  %v310_v56 = vld [vmem:[%s1361_s18 + $0x110] sm:$0xff]  ;;  %p1052_p7 = pnand %p1051_p5, %p1045_p11 }
  0x87   : > { %742 = vmatpush1.bf16.xpose.msra.mxu1 %v741_v26  ;;  %v815_v53 = vpack.c.bf16 %v315_v49, %v311_v48  ;;  %v312_v55 = vld [vmem:[%s1361_s18 + $0x120] sm:$0xff]  ;;  %v314_v57 = vld [vmem:[%s1361_s18 + $0x130] sm:$0xff]  ;;  %v317_v58 = vld [vmem:[%s1361_s18 + $0x148] sm:$0xff] }
  0x88   : > { %806 = vmatpush1.bf16.xpose.msra.mxu0 %v805_v27  ;;  %744 = vmatprep.subr.bf16.mxu1 %v743_v28  ;;  %v321_v59 = vld [vmem:[%s1361_s18 + $0x168] sm:$0xff]  ;;  %v319_v60 = vld [vmem:[%s1361_s18 + $0x158] sm:$0xff]  ;;  %v753_v62 = vpack.c.bf16 %v312_v55, %v308_v54  ;;  %v817_v63 = vpack.c.bf16 %v314_v57, %v310_v56  ;;  %v316_v2 = vld [vmem:[%s1361_s18 + $0x140] sm:$0xff] }
  0x89   : > { %808 = vmatprep.subr.bf16.mxu0 %v807_v29  ;;  %v323_v61 = vld [vmem:[%s1361_s18 + $0x178] sm:$0xff]  ;;  %v755_v0 = vpack.c.bf16 %v321_v59, %v317_v58  ;;  %v320_v3 = vld [vmem:[%s1361_s18 + $0x160] sm:$0xff]  ;;  %v318_v4 = vld [vmem:[%s1361_s18 + $0x150] sm:$0xff] }
  0x8a   : > { %v819_v1 = vpack.c.bf16 %v323_v61, %v319_v60  ;;  %v322_v5 = vld [vmem:[%s1361_s18 + $0x170] sm:$0xff]  ;;  %v325_v6 = vld [vmem:[%s1361_s18 + $0x188] sm:$0xff]  ;;  %v327_v8 = vld [vmem:[%s1361_s18 + $0x198] sm:$0xff]  ;;  %v757_v10 = vpack.c.bf16 %v320_v3, %v316_v2 }
  0x8b   : > { %v329_v7 = vld [vmem:[%s1361_s18 + $0x1a8] sm:$0xff]  ;;  %v331_v9 = vld [vmem:[%s1361_s18 + $0x1b8] sm:$0xff]  ;;  %v821_v11 = vpack.c.bf16 %v322_v5, %v318_v4  ;;  %v324_v16 = vld [vmem:[%s1361_s18 + $0x180] sm:$0xff] }
  0x8c   : > { %v759_v12 = vpack.c.bf16 %v329_v7, %v325_v6  ;;  %v823_v13 = vpack.c.bf16 %v331_v9, %v327_v8  ;;  %v269_v14 = vld [vmem:[#allocation2 + $0x8] sm:$0xff]  ;;  %v271_v15 = vld [vmem:[#allocation2 + $0x18] sm:$0xff]  ;;  %v328_v17 = vld [vmem:[%s1361_s18 + $0x1a0] sm:$0xff] }
  0x8d   : > { %480 = vmatprep.mubr.f32.mxu1 %v269_v14  ;;  %557 = vmatprep.mubr.f32.mxu0 %v271_v15  ;;  %v326_v18 = vld [vmem:[%s1361_s18 + $0x190] sm:$0xff]  ;;  %v333_v20 = vld [vmem:[%s1361_s18 + $0x1c8] sm:$0xff]  ;;  %v335_v22 = vld [vmem:[%s1361_s18 + $0x1d8] sm:$0xff]  ;;  %v761_v24 = vpack.c.bf16 %v328_v17, %v324_v16 }
  0x8e   : > { %v330_v19 = vld [vmem:[%s1361_s18 + $0x1b0] sm:$0xff]  ;;  %v337_v21 = vld [vmem:[%s1361_s18 + $0x1e8] sm:$0xff]  ;;  %v339_v23 = vld [vmem:[%s1361_s18 + $0x1f8] sm:$0xff] }
  0x8f   : > { %746 = vmatpush1.bf16.xpose.msra.mxu1 %v745_v38  ;;  %v825_v25 = vpack.c.bf16 %v330_v19, %v326_v18  ;;  %v763_v26 = vpack.c.bf16 %v337_v21, %v333_v20  ;;  %v827_v27 = vpack.c.bf16 %v339_v23, %v335_v22  ;;  %v332_v28 = vld [vmem:[%s1361_s18 + $0x1c0] sm:$0xff]  ;;  %v334_v30 = vld [vmem:[%s1361_s18 + $0x1d0] sm:$0xff]  ;;  %v341_v32 = vld [vmem:[%s1361_s18 + $0x208] sm:$0xff] }
  0x90   : > { %810 = vmatpush1.bf16.xpose.msra.mxu0 %v809_v39  ;;  %748 = vmatprep.subr.bf16.mxu1 %v747_v40  ;;  %v336_v29 = vld [vmem:[%s1361_s18 + $0x1e0] sm:$0xff]  ;;  %v338_v31 = vld [vmem:[%s1361_s18 + $0x1f0] sm:$0xff]  ;;  %v345_v33 = vld [vmem:[%s1361_s18 + $0x228] sm:$0xff] }
  0x91   : > { %812 = vmatprep.subr.bf16.mxu0 %v811_v41  ;;  %v343_v34 = vld [vmem:[%s1361_s18 + $0x218] sm:$0xff]  ;;  %v765_v36 = vpack.c.bf16 %v336_v29, %v332_v28  ;;  %v829_v37 = vpack.c.bf16 %v338_v31, %v334_v30  ;;  %v767_v38 = vpack.c.bf16 %v345_v33, %v341_v32  ;;  %v340_v40 = vld [vmem:[%s1361_s18 + $0x200] sm:$0xff]  ;;  %v342_v42 = vld [vmem:[%s1361_s18 + $0x210] sm:$0xff] }
  0x92   : > { %v347_v35 = vld [vmem:[%s1361_s18 + $0x238] sm:$0xff]  ;;  %v344_v41 = vld [vmem:[%s1361_s18 + $0x220] sm:$0xff]  ;;  %v346_v43 = vld [vmem:[%s1361_s18 + $0x230] sm:$0xff] }
  0x93   : > { %v831_v39 = vpack.c.bf16 %v347_v35, %v343_v34  ;;  %v349_v44 = vld [vmem:[%s1361_s18 + $0x248] sm:$0xff]  ;;  %v351_v46 = vld [vmem:[%s1361_s18 + $0x258] sm:$0xff]  ;;  %v769_v48 = vpack.c.bf16 %v344_v41, %v340_v40  ;;  %v833_v49 = vpack.c.bf16 %v346_v43, %v342_v42  ;;  %v350_v54 = vld [vmem:[%s1361_s18 + $0x250] sm:$0xff] }
  0x94   : > { %v353_v45 = vld [vmem:[%s1361_s18 + $0x268] sm:$0xff]  ;;  %v355_v47 = vld [vmem:[%s1361_s18 + $0x278] sm:$0xff]  ;;  %v354_v55 = vld [vmem:[%s1361_s18 + $0x270] sm:$0xff] }
  0x95   : > { %v357_v56 = vld [vmem:[%s1361_s18 + $0x288] sm:$0xff]  ;;  %v359_v58 = vld [vmem:[%s1361_s18 + $0x298] sm:$0xff]  ;;  %v837_v61 = vpack.c.bf16 %v354_v55, %v350_v54  ;;  %v358_v2 = vld [vmem:[%s1361_s18 + $0x290] sm:$0xff] }
  0x96   : > { %v361_v57 = vld [vmem:[%s1361_s18 + $0x2a8] sm:$0xff]  ;;  %v363_v59 = vld [vmem:[%s1361_s18 + $0x2b8] sm:$0xff]  ;;  %v362_v3 = vld [vmem:[%s1361_s18 + $0x2b0] sm:$0xff] }
  0x97   : > { %750 = vmatpush1.bf16.xpose.msra.mxu1 %v749_v50  ;;  %v771_v50 = vpack.c.bf16 %v353_v45, %v349_v44  ;;  %v365_v4 = vld [vmem:[%s1361_s18 + $0x2c8] sm:$0xff]  ;;  %v367_v6 = vld [vmem:[%s1361_s18 + $0x2d8] sm:$0xff]  ;;  %v841_v9 = vpack.c.bf16 %v362_v3, %v358_v2  ;;  %v366_v14 = vld [vmem:[%s1361_s18 + $0x2d0] sm:$0xff] }
  0x98   : > { %814 = vmatpush1.bf16.xpose.msra.mxu0 %v813_v51  ;;  %752 = vmatprep.subr.bf16.mxu1 %v751_v52  ;;  %v835_v51 = vpack.c.bf16 %v355_v47, %v351_v46  ;;  %v348_v52 = vld [vmem:[%s1361_s18 + $0x240] sm:$0xff]  ;;  %v369_v5 = vld [vmem:[%s1361_s18 + $0x2e8] sm:$0xff]  ;;  %v371_v7 = vld [vmem:[%s1361_s18 + $0x2f8] sm:$0xff] }
  0x99   : > { %816 = vmatprep.subr.bf16.mxu0 %v815_v53  ;;  %v352_v53 = vld [vmem:[%s1361_s18 + $0x260] sm:$0xff]  ;;  %v370_v15 = vld [vmem:[%s1361_s18 + $0x2f0] sm:$0xff]  ;;  %v373_v16 = vld [vmem:[%s1361_s18 + $0x308] sm:$0xff] }
  0x9a   : > { %v773_v60 = vpack.c.bf16 %v352_v53, %v348_v52  ;;  %v377_v17 = vld [vmem:[%s1361_s18 + $0x328] sm:$0xff]  ;;  %v375_v18 = vld [vmem:[%s1361_s18 + $0x318] sm:$0xff]  ;;  %v845_v21 = vpack.c.bf16 %v370_v15, %v366_v14  ;;  %v268_v2 = vld [vmem:[#allocation2] sm:$0xff] }
  0x9b   : > { %v379_v19 = vld [vmem:[%s1361_s18 + $0x338] sm:$0xff]  ;;  %v783_v22 = vpack.c.bf16 %v377_v17, %v373_v16  ;;  %v381_v28 = vld [vmem:[%s1361_s18 + $0x348] sm:$0xff]  ;;  %v270_v3 = vld [vmem:[#allocation2 + $0x10] sm:$0xff] }
  0x9c   : > { %v847_v23 = vpack.c.bf16 %v379_v19, %v375_v18  ;;  %v385_v29 = vld [vmem:[%s1361_s18 + $0x368] sm:$0xff]  ;;  %v383_v30 = vld [vmem:[%s1361_s18 + $0x358] sm:$0xff] }
  0x9d   : > { %v387_v31 = vld [vmem:[%s1361_s18 + $0x378] sm:$0xff]  ;;  %v787_v34 = vpack.c.bf16 %v385_v29, %v381_v28  ;;  %v389_v40 = vld [vmem:[%s1361_s18 + $0x388] sm:$0xff] }
  0x9e   : > { %v851_v35 = vpack.c.bf16 %v387_v31, %v383_v30  ;;  %v393_v41 = vld [vmem:[%s1361_s18 + $0x3a8] sm:$0xff]  ;;  %v391_v42 = vld [vmem:[%s1361_s18 + $0x398] sm:$0xff] }
  0x9f   : > { %754 = vmatpush1.bf16.xpose.msra.mxu1 %v753_v62  ;;  %v775_v62 = vpack.c.bf16 %v361_v57, %v357_v56  ;;  %v395_v43 = vld [vmem:[%s1361_s18 + $0x3b8] sm:$0xff]  ;;  %v791_v46 = vpack.c.bf16 %v393_v41, %v389_v40  ;;  %v397_v52 = vld [vmem:[%s1361_s18 + $0x3c8] sm:$0xff] }
  0xa0   : > { %818 = vmatpush1.bf16.xpose.msra.mxu0 %v817_v63  ;;  %756 = vmatprep.subr.bf16.mxu1 %v755_v0  ;;  %v839_v63 = vpack.c.bf16 %v363_v59, %v359_v58  ;;  %v356_v0 = vld [vmem:[%s1361_s18 + $0x280] sm:$0xff]  ;;  %v855_v47 = vpack.c.bf16 %v395_v43, %v391_v42  ;;  %v401_v53 = vld [vmem:[%s1361_s18 + $0x3e8] sm:$0xff]  ;;  %v399_v54 = vld [vmem:[%s1361_s18 + $0x3d8] sm:$0xff] }
  0xa1   : > { %820 = vmatprep.subr.bf16.mxu0 %v819_v1  ;;  %v360_v1 = vld [vmem:[%s1361_s18 + $0x2a0] sm:$0xff]  ;;  %v403_v55 = vld [vmem:[%s1361_s18 + $0x3f8] sm:$0xff]  ;;  %v795_v58 = vpack.c.bf16 %v401_v53, %v397_v52 }
  0xa2   : > { %v777_v8 = vpack.c.bf16 %v360_v1, %v356_v0  ;;  %v859_v59 = vpack.c.bf16 %v403_v55, %v399_v54 }
  0xa7   : > { %758 = vmatpush1.bf16.xpose.msra.mxu1 %v757_v10  ;;  %v779_v10 = vpack.c.bf16 %v369_v5, %v365_v4  ;;  %v273_v4 = vld [vmem:[#allocation2 + $0x28] sm:$0xff]  ;;  %v275_v5 = vld [vmem:[#allocation2 + $0x38] sm:$0xff] }
  0xa8   : > { %822 = vmatpush1.bf16.xpose.msra.mxu0 %v821_v11  ;;  %760 = vmatprep.subr.bf16.mxu1 %v759_v12  ;;  %v843_v11 = vpack.c.bf16 %v371_v7, %v367_v6  ;;  %v364_v12 = vld [vmem:[%s1361_s18 + $0x2c0] sm:$0xff]  ;;  %v274_v7 = vld [vmem:[#allocation2 + $0x30] sm:$0xff] }
  0xa9   : > { %824 = vmatprep.subr.bf16.mxu0 %v823_v13  ;;  %v368_v13 = vld [vmem:[%s1361_s18 + $0x2e0] sm:$0xff] }
  0xaa   : > { %v781_v20 = vpack.c.bf16 %v368_v13, %v364_v12  ;;  %v272_v6 = vld [vmem:[#allocation2 + $0x20] sm:$0xff] }
  0xaf   : > { %762 = vmatpush1.bf16.xpose.msra.mxu1 %v761_v24  ;;  %v372_v24 = vld [vmem:[%s1361_s18 + $0x300] sm:$0xff] }
  0xb0   : > { %826 = vmatpush1.bf16.xpose.msra.mxu0 %v825_v25  ;;  %764 = vmatprep.subr.bf16.mxu1 %v763_v26  ;;  %v376_v25 = vld [vmem:[%s1361_s18 + $0x320] sm:$0xff]  ;;  %v374_v26 = vld [vmem:[%s1361_s18 + $0x310] sm:$0xff] }
  0xb1   : > { %828 = vmatprep.subr.bf16.mxu0 %v827_v27  ;;  %v378_v27 = vld [vmem:[%s1361_s18 + $0x330] sm:$0xff]  ;;  %v785_v32 = vpack.c.bf16 %v376_v25, %v372_v24 }
  0xb2   : > { %v849_v33 = vpack.c.bf16 %v378_v27, %v374_v26 }
  0xb7   : > { %766 = vmatpush1.bf16.xpose.msra.mxu1 %v765_v36  ;;  %v380_v36 = vld [vmem:[%s1361_s18 + $0x340] sm:$0xff] }
  0xb8   : > { %830 = vmatpush1.bf16.xpose.msra.mxu0 %v829_v37  ;;  %768 = vmatprep.subr.bf16.mxu1 %v767_v38  ;;  %v384_v37 = vld [vmem:[%s1361_s18 + $0x360] sm:$0xff]  ;;  %v382_v38 = vld [vmem:[%s1361_s18 + $0x350] sm:$0xff] }
  0xb9   : > { %832 = vmatprep.subr.bf16.mxu0 %v831_v39  ;;  %v386_v39 = vld [vmem:[%s1361_s18 + $0x370] sm:$0xff]  ;;  %v789_v44 = vpack.c.bf16 %v384_v37, %v380_v36 }
  0xba   : > { %v853_v45 = vpack.c.bf16 %v386_v39, %v382_v38 }
  0xbf   : > { %770 = vmatpush1.bf16.xpose.msra.mxu1 %v769_v48  ;;  %v388_v48 = vld [vmem:[%s1361_s18 + $0x380] sm:$0xff] }
  0xc0   : > { %834 = vmatpush1.bf16.xpose.msra.mxu0 %v833_v49  ;;  %772 = vmatprep.subr.bf16.mxu1 %v771_v50  ;;  %v392_v49 = vld [vmem:[%s1361_s18 + $0x3a0] sm:$0xff]  ;;  %v390_v50 = vld [vmem:[%s1361_s18 + $0x390] sm:$0xff] }
  0xc1   : > { %836 = vmatprep.subr.bf16.mxu0 %v835_v51  ;;  %v394_v51 = vld [vmem:[%s1361_s18 + $0x3b0] sm:$0xff]  ;;  %v793_v56 = vpack.c.bf16 %v392_v49, %v388_v48 }
  0xc2   : > { %v857_v57 = vpack.c.bf16 %v394_v51, %v390_v50 }
  0xc7   : > { %774 = vmatpush1.bf16.xpose.msra.mxu1 %v773_v60  ;;  %v396_v60 = vld [vmem:[%s1361_s18 + $0x3c0] sm:$0xff] }
  0xc8   : > { %838 = vmatpush1.bf16.xpose.msra.mxu0 %v837_v61  ;;  %776 = vmatprep.subr.bf16.mxu1 %v775_v62  ;;  %v400_v61 = vld [vmem:[%s1361_s18 + $0x3e0] sm:$0xff]  ;;  %v398_v62 = vld [vmem:[%s1361_s18 + $0x3d0] sm:$0xff] }
  0xc9   : > { %840 = vmatprep.subr.bf16.mxu0 %v839_v63  ;;  %v402_v63 = vld [vmem:[%s1361_s18 + $0x3f0] sm:$0xff]  ;;  %v797_v0 = vpack.c.bf16 %v400_v61, %v396_v60 }
  0xca   : > { %v861_v1 = vpack.c.bf16 %v402_v63, %v398_v62 }
  0xcf   : > { %778 = vmatpush1.bf16.xpose.msra.mxu1 %v777_v8  ;;  %v406_v8 = vlaneseq }
  0xd0   : > { %842 = vmatpush1.bf16.xpose.msra.mxu0 %v841_v9  ;;  %780 = vmatprep.subr.bf16.mxu1 %v779_v10 }
  0xd1   : > { %844 = vmatprep.subr.bf16.mxu0 %v843_v11  ;;  %v407_v9 = vshrl.u32 %v406_v8, 7  ;;  %v404_v11 = vld [vmem:[%s235_s26] sm:$0x3] }
  0xd3   : > { %v408_v10 = vsub.s32 0, %v407_v9  ;;  %v412_v12 = vsub.s32 1, %v407_v9 }
  0xd5   : > { %v409_v13 = vrot.slane %v404_v11, %v408_v10  ;;  %v413_v14 = vrot.slane %v404_v11, %v412_v12 }
  0xd7   : > { %782 = vmatpush1.bf16.xpose.msra.mxu1 %v781_v20 }
  0xd8   : > { %846 = vmatpush1.bf16.xpose.msra.mxu0 %v845_v21  ;;  %784 = vmatprep.subr.bf16.mxu1 %v783_v22 }
  0xd9   : > { %848 = vmatprep.subr.bf16.mxu0 %v847_v23 }
  0xdf   : > { %786 = vmatpush1.bf16.xpose.msra.mxu1 %v785_v32 }
  0xe0   : > { %850 = vmatpush1.bf16.xpose.msra.mxu0 %v849_v33  ;;  %788 = vmatprep.subr.bf16.mxu1 %v787_v34 }
  0xe1   : > { %852 = vmatprep.subr.bf16.mxu0 %v851_v35 }
  0xe7   : > { %790 = vmatpush1.bf16.xpose.msra.mxu1 %v789_v44 }
  0xe8   : > { %854 = vmatpush1.bf16.xpose.msra.mxu0 %v853_v45  ;;  %792 = vmatprep.subr.bf16.mxu1 %v791_v46 }
  0xe9   : > { %856 = vmatprep.subr.bf16.mxu0 %v855_v47 }
  0xef   : > { %794 = vmatpush1.bf16.xpose.msra.mxu1 %v793_v56 }
  0xf0   : > { %858 = vmatpush1.bf16.xpose.msra.mxu0 %v857_v57  ;;  %796 = vmatprep.subr.bf16.mxu1 %v795_v58 }
  0xf1   : > { %860 = vmatprep.subr.bf16.mxu0 %v859_v59 }
  0xf7   : > { %798 = vmatpush1.bf16.xpose.msra.mxu1 %v797_v0 }
  0xf8   : > { %862 = vmatpush1.bf16.xpose.msra.mxu0 %v861_v1 }
  0xfe   : > { %481 = vmatmul.mubr.f32.vlgmr.msra.gmra.mrb[0].mxu1 %v268_v2 }
  0xff   : > { %558 = vmatmul.mubr.f32.vlgmr.msra.gmra.mrb[0].mxu0 %v270_v3  ;;  %486 = vmatprep.mubr.f32.mxu1 %v273_v4 }
 0x100   : > { %563 = vmatprep.mubr.f32.mxu0 %v275_v5 }
 0x102   : > { %487 = vmatmul.mubr.f32.gmra.mrb[2].mxu1 %v272_v6 }
 0x103   : > { %564 = vmatmul.mubr.f32.gmra.mrb[2].mxu0 %v274_v7 }
 0x1d1   : > { %v482_v15 = vpop.f32.mrb[0].mxu1 }
 0x1d2   : > { %v483_v16 = vadd.f32 %v482_v15, %v409_v13  ;;  %v484_v17 = vpop.f32.mrb[1].mxu1  ;;  %v559_v18 = vpop.f32.mrb[0].mxu0 }
 0x1d3   : > { %v485_v19 = vadd.f32 %v484_v17, %v413_v14  ;;  %v561_v20 = vpop.f32.mrb[1].mxu0 }
 0x1d4   : > { %v560_v21 = vadd.f32 %v559_v18, %v483_v16 }
 0x1d5   : > { %v562_v22 = vadd.f32 %v561_v20, %v485_v19  ;;  %v488_v23 = vpop.f32.mrb[2].mxu1 }
 0x1d6   : > { %570 = vst [vmem:[%s262_s7] sm:$0xff] %v560_v21  ;;  %v489_v24 = vadd.f32 %v488_v23, %v409_v13  ;;  %v490_v25 = vpop.f32.mrb[3].mxu1  ;;  %v565_v26 = vpop.f32.mrb[2].mxu0 }
 0x1d7   : > { %571 = vst [vmem:[%s262_s7 + $0x8] sm:$0xff] %v562_v22  ;;  %v491_v27 = vadd.f32 %v490_v25, %v413_v14  ;;  %v567_v28 = vpop.f32.mrb[3].mxu0 }
 0x1d8   : > { %v566_v29 = vadd.f32 %v565_v26, %v489_v24 }
 0x1d9   : > { %v568_v30 = vadd.f32 %v567_v28, %v491_v27 }
 0x1da   : > { %572 = vst [vmem:[%s262_s7 + $0x10] sm:$0xff] %v566_v29 }
 0x1db   : > { %573 = vst [vmem:[%s262_s7 + $0x18] sm:$0xff] %v568_v30 }
 0x1dc   : > { %1055 = shalt.err (!%p1052_p7)
}
 0x1dd   : > { %s1056_s30 = scalar_lea.hbm %s1503_s11, 512  ;;  %s1060_s1 = scalar_lea.hbm %s1554_s3, 2048 }
 0x1de   : > { %p1057_p9 = scmp.ne.s32.totalorder %s1503_s11, %s1056_s30  ;;  %p1061_p10 = scmp.lt.u32.totalorder %s1503_s11, %s1554_s3 }
 0x1df   : > { %p1062_p2 = scmp.lt.u32.totalorder %s1060_s1, %s1056_s30  ;;  %p1064_p3 = scmp.lt.u32.totalorder %s1056_s30, %s1503_s11 }
 0x1e0   : > { %p1058_p12 = pnand %p1057_p9, %p1584_p4 }
 0x1e1   : > { %p1063_p0 = por %p1062_p2, %p1061_p10 }
 0x1e2   : > { %p1059_p6 = pneg %p1058_p12 }
 0x1e3   : > { %p1065_p1 = por %p1064_p3, %p1063_p0 }
 0x1e5   : > { %p1066_p11 = pnand %p1065_p1, %p1059_p6 }
 0x1e7   : > { %1069 = shalt.err (!%p1066_p11)
}
 0x1e8   : > { %s1136_s26 = smov 256   ;;  %s1137_s28 = smov 1024  }
 0x1e9   : > { %s1138_s7 = smov 16  }
 0x1ea   : > { %879 = dma.vmem_to_hbm [thread:$0]  (%p1584_p4), %s1498_s8, 512, %s1503_s11, %s575_s15, %s1136_s26, %s1137_s28, %s1138_s7  }
 0x1eb PF: > { %p899_p13 = scmp.ge.s32.totalorder %s1128_s17, 2  ;;  %s606_s21 = sand.u32 1, %s1108_s12  }
 0x1ec   : > { %p1585_p8 = scmp.ne.s32.totalorder %s1572_s4, 0  ;;  %s607_s27 = scalar_lea.sflag [#allocation4], %s606_s21 }
 0x1ee   : > { %p893_p5 = pnand %p899_p13, %p1585_p8 }
 0x1f0   : > { %1103 = dma.done.wait (!%p893_p5), %s607_s27, 512  }
 0x1f1   : > { %1105 = vsyncadd (!%p893_p5), %s607_s27, 4294966784  ;;  %s20_s17 = sadd.s32 1, %s1128_s17   ;;  %s1586_s29 = sld [smem:[#allocation12_spill]] }
 0x1f2   : > { %p17_p7 = scmp.ge.s32.totalorder %s20_s17, 6   ;;  %s1587_s12 = smov %s1112_s13 }
 0x1f3   : > { %s1588_s13 = smov %s1116_s14  ;;  %s1589_s14 = smov %s1209_s24 }
 0x1f4   : > { %s1590_s15 = smov %s1124_s16  ;;  %19 = sbr.rel (!%p17_p7) target bundleno = 9 (0x9), region = 94 }
 0x1f7   : > { %s1591_s16 = smov %s1586_s29 }
 0x1fb   :  { %612 = vsyncpa [#allocation3], 1 }
 0x1fc   :  { %614 = vsyncpa [#allocation3 + $0x1], 1 }
 0x1fd   :  { %615 = vsyncpa [#allocation6], 1 }
 0x1fe   :  { %617 = vsyncpa [#allocation6 + $0x1], 1 }
 0x1ff   :  { %618 = vsyncpa [#allocation4], 1 }
 0x200   :  { %620 = vsyncpa [#allocation4 + $0x1], 1 }

</bundles_post_ra>
